<compile_context>
chip_gen: v6e
topology: v6e:2x2x1
jax: 0.10.0
libtpu: 0.0.40
codegen_flags: <defaults>
</compile_context>

<pallas_src>
import jax
import jax.numpy as jnp
from jax.experimental import pallas as pl
from jax.experimental.pallas import tpu as pltpu

EPS = 1e-5
LANE = 128


def _fused_model_kernel(ids_ref, img_ref,
                        table_ref,                 # per-site relu(E@Ws+bs)@W1_site + b1
                        w1_ref,                    # W1_img (bf16)
                        w2_ref, b2_ref,            # BN-folded fc2
                        w3_ref, b3_ref,            # padded fc3
                        out_ref):
    # --- site encoder + embedding lookup, folded into a one-hot @ table matmul ---
    num_sites = table_ref.shape[0]
    ids = ids_ref[...]                                              # (tb, 1) int32
    site_iota = jax.lax.broadcasted_iota(jnp.int32, (1, num_sites), 1)
    onehot = (ids == site_iota).astype(jnp.float32)                 # (tb, S)
    site_h1 = jnp.dot(onehot, table_ref[...],
                      preferred_element_type=jnp.float32)           # (tb, 1024), b1 included

    # --- fc1: concat(img, site_enc) @ W1 + b1 == img @ W1_img + site_h1 ---
    h1 = jnp.dot(img_ref[...].astype(jnp.bfloat16), w1_ref[...],
                 preferred_element_type=jnp.float32)
    h1 = jnp.maximum(h1 + site_h1, 0.0)                             # (tb, 1024)
    # dropout: eval mode -> identity

    # --- fc2 with BatchNorm folded into (W2', b2'), then relu ---
    h2 = jnp.dot(h1.astype(jnp.bfloat16), w2_ref[...],
                 preferred_element_type=jnp.float32) + b2_ref[...]
    h2 = jnp.maximum(h2, 0.0)                                       # (tb, 128)
    # dropout: eval mode -> identity

    # --- fc3 (output padded to a lane-dense 128-wide slab) ---
    out_ref[...] = (jnp.dot(h2.astype(jnp.bfloat16), w3_ref[...],
                            preferred_element_type=jnp.float32)
                    + b3_ref[...]).astype(out_ref.dtype)


def prepare_inference_params(params):
    """Fold BN into fc2, precompute the site-path table, cast weights to bf16, pad fc3."""
    # Per-site table: relu(E @ W_site + b_site) @ W1_site + b1   (f32, tiny: S x 1024).
    site_enc = jnp.maximum(
        params["embedding"] @ params["w_site"] + params["b_site"], 0.0)
    site_table = site_enc @ params["w1_site"] + params["b1"]        # (S, 1024)

    # Fold BatchNorm (running stats) into fc2.
    scale = params["bn_gamma"] * jax.lax.rsqrt(params["bn_var"] + EPS)   # (1, 128)
    w2_f = (params["w2"] * scale).astype(jnp.bfloat16)
    b2_f = (params["b2"] - params["bn_mean"]) * scale + params["bn_beta"]

    # Pad fc3 to a lane-dense output slab.
    num_classes = params["w3"].shape[1]
    c_pad = max(LANE, ((num_classes + LANE - 1) // LANE) * LANE)
    w3_p = jnp.zeros((params["w3"].shape[0], c_pad), jnp.float32)
    w3_p = w3_p.at[:, :num_classes].set(params["w3"]).astype(jnp.bfloat16)
    b3_p = jnp.zeros((1, c_pad), jnp.float32).at[:, :num_classes].set(params["b3"])

    return dict(
        site_table=site_table,
        w1_img=params["w1_img"].astype(jnp.bfloat16),
        w2=w2_f, b2=b2_f,
        w3=w3_p, b3=b3_p,
        num_classes=num_classes,
    )


def model_forward(img_features, site_ids, prep):
    """img_features: (B, F) f32, site_ids: (B,) int32, prep: prepared params."""
    B, F = img_features.shape
    S, H1 = prep["site_table"].shape      # (num_sites, 1024)
    H2 = prep["w2"].shape[1]              # 128
    C_pad = prep["w3"].shape[1]
    num_classes = prep["num_classes"]

    # Pad the batch up to a sublane multiple (8) so block shapes are always legal.
    pad_b = (-B) % 8
    if pad_b:
        img_features = jnp.pad(img_features, ((0, pad_b), (0, 0)))
        site_ids = jnp.pad(site_ids, ((0, pad_b),))
    Bp = B + pad_b
    ids2d = site_ids.reshape(Bp, 1).astype(jnp.int32)

    block_b = Bp if Bp <= 256 else 256
    grid = (pl.cdiv(Bp, block_b),)

    flops = 2 * Bp * (S * H1 + F * H1 + H1 * H2 + H2 * C_pad)
    bytes_accessed = (
        Bp * F * 4 + Bp * 4                          # img features + site ids
        + S * H1 * 4                                 # site table (b1 folded in)
        + F * H1 * 2                                 # w1_img (bf16)
        + H1 * H2 * 2 + H2 * 4                       # w2' (bf16, BN folded) + b2'
        + H2 * C_pad * 2 + C_pad * 4                 # w3 (bf16, padded) + b3
        + Bp * C_pad * 4                             # output
    )

    out = pl.pallas_call(
        _fused_model_kernel,
        out_shape=jax.ShapeDtypeStruct((Bp, C_pad), jnp.float32),
        grid=grid,
        in_specs=[
            pl.BlockSpec((block_b, 1), lambda i: (i, 0)),      # site ids
            pl.BlockSpec((block_b, F), lambda i: (i, 0)),      # img features
            pl.BlockSpec((S, H1), lambda i: (0, 0)),           # site table (resident)
            pl.BlockSpec((F, H1), lambda i: (0, 0)),           # w1_img (resident)
            pl.BlockSpec((H1, H2), lambda i: (0, 0)),          # w2' (BN folded)
            pl.BlockSpec((1, H2), lambda i: (0, 0)),           # b2'
            pl.BlockSpec((H2, C_pad), lambda i: (0, 0)),       # w3 (padded)
            pl.BlockSpec((1, C_pad), lambda i: (0, 0)),        # b3 (padded)
        ],
        out_specs=pl.BlockSpec((block_b, C_pad), lambda i: (i, 0)),
        compiler_params=pltpu.CompilerParams(
            dimension_semantics=("parallel",),
            vmem_limit_bytes=16 << 20,               # footprint ~2 MB; headroom
        ),
        cost_estimate=pl.CostEstimate(
            flops=flops, transcendentals=0, bytes_accessed=bytes_accessed),
    )(ids2d, img_features,
      prep["site_table"], prep["w1_img"],
      prep["w2"], prep["b2"],
      prep["w3"], prep["b3"])

    return out[:B, :num_classes]


def init_params(key, *, feature_vector, num_sites, embedding_dim, num_classes):
    """Deterministic synthetic parameters matching the PyTorch module shapes (f32)."""
    ks = jax.random.split(key, 10)

    def lin(k, fan_in, fan_out):
        bound = 1.0 / jnp.sqrt(fan_in)
        kw, kb = jax.random.split(k)
        w = jax.random.uniform(kw, (fan_in, fan_out), jnp.float32, -bound, bound)
        b = jax.random.uniform(kb, (1, fan_out), jnp.float32, -bound, bound)
        return w, b

    embedding = jax.random.normal(ks[0], (num_sites, embedding_dim), jnp.float32)
    w_site, b_site = lin(ks[1], embedding_dim, 512)

    # fc1: (feature_vector + 512) -> 1024, stored split to fold the concat.
    w1_full, b1 = lin(ks[2], feature_vector + 512, 1024)
    w1_img, w1_site = w1_full[:feature_vector], w1_full[feature_vector:]

    w2, b2 = lin(ks[3], 1024, 128)
    w3, b3 = lin(ks[4], 128, num_classes)

    return dict(
        embedding=embedding,
        w_site=w_site, b_site=b_site,
        w1_img=w1_img, w1_site=w1_site, b1=b1,
        w2=w2, b2=b2,
        bn_gamma=jnp.ones((1, 128), jnp.float32),
        bn_beta=jnp.zeros((1, 128), jnp.float32),
        bn_mean=jnp.zeros((1, 128), jnp.float32),
        bn_var=jnp.ones((1, 128), jnp.float32),
        w3=w3, b3=b3,
    )


def reference_forward_f32(img_features, site_ids, params):
    """Pure-JAX f32 reference of the original module (BN explicit, no folding)."""
    site = jnp.take(params["embedding"], site_ids, axis=0)
    site = jnp.maximum(site @ params["w_site"] + params["b_site"], 0.0)
    h1 = jnp.maximum(img_features @ params["w1_img"] + site @ params["w1_site"]
                     + params["b1"], 0.0)
    h2 = h1 @ params["w2"] + params["b2"]
    h2 = (h2 - params["bn_mean"]) * jax.lax.rsqrt(params["bn_var"] + EPS) \
         * params["bn_gamma"] + params["bn_beta"]
    h2 = jnp.maximum(h2, 0.0)
    return h2 @ params["w3"] + params["b3"]


def reference_forward_prepared(img_features, site_ids, prep):
    """Pure-JAX reference that mirrors the kernel's bf16/folded math exactly."""
    sc = jnp.take(prep["site_table"], site_ids, axis=0)              # includes b1
    h1 = jnp.dot(img_features.astype(jnp.bfloat16), prep["w1_img"],
                 preferred_element_type=jnp.float32)
    h1 = jnp.maximum(h1 + sc, 0.0)
    h2 = jnp.maximum(jnp.dot(h1.astype(jnp.bfloat16), prep["w2"],
                             preferred_element_type=jnp.float32) + prep["b2"], 0.0)
    out = jnp.dot(h2.astype(jnp.bfloat16), prep["w3"],
                  preferred_element_type=jnp.float32) + prep["b3"]
    return out[:, :prep["num_classes"]]


if __name__ == "__main__":
    B = 8                 # batch
    FEATURE_VECTOR = 256  # image-encoder pooled feature dim (backbone output)
    NUM_SITES = 16
    EMBEDDING_DIM = 128
    NUM_CLASSES = 10

    key = jax.random.PRNGKey(0)
    k_img, k_site, k_params = jax.random.split(key, 3)

    img_features = jax.random.normal(k_img, (B, FEATURE_VECTOR), jnp.float32)
    site_ids = jax.random.randint(k_site, (B,), 0, NUM_SITES, jnp.int32)
    params = init_params(k_params, feature_vector=FEATURE_VECTOR,
                         num_sites=NUM_SITES, embedding_dim=EMBEDDING_DIM,
                         num_classes=NUM_CLASSES)

    prep = prepare_inference_params(params)

    out = model_forward(img_features, site_ids, prep)
    out = jax.block_until_ready(out)
    assert out.shape == (B, NUM_CLASSES)

    # Strict check vs. a reference that uses the same bf16/folded parameters.
    ref_prep = reference_forward_prepared(img_features, site_ids, prep)
    assert jnp.allclose(out, ref_prep, atol=2e-3, rtol=2e-3), \
        "mismatch vs prepared-params reference"

    # Loose check vs. the original f32 module semantics (bf16 weight rounding).
    ref_f32 = reference_forward_f32(img_features, site_ids, params)
    assert jnp.allclose(out, ref_f32, atol=7.5e-2, rtol=5e-2), \
        "mismatch vs f32 module reference"

    print("KERNEL_OK")
</pallas_src>

<mosaic_0001>
module attributes {stable_mosaic.version = 11 : i64} {
  func.func @_fused_model_kernel(%arg0: i32, %arg1: memref<8x1xi32, #tpu.memory_space<vmem>>, %arg2: memref<8x256xf32, #tpu.memory_space<vmem>>, %arg3: memref<16x1024xf32, #tpu.memory_space<vmem>>, %arg4: memref<256x1024xbf16, #tpu.memory_space<vmem>>, %arg5: memref<1024x128xbf16, #tpu.memory_space<vmem>>, %arg6: memref<1x128xf32, #tpu.memory_space<vmem>>, %arg7: memref<128x128xbf16, #tpu.memory_space<vmem>>, %arg8: memref<1x128xf32, #tpu.memory_space<vmem>>, %arg9: memref<8x128xf32, #tpu.memory_space<vmem>>) attributes {dimension_semantics = [#tpu.dimension_semantics<parallel>], iteration_bounds = array<i64: 1>, scalar_prefetch = 0 : i64, scratch_operands = 0 : i64, tpu.core_type = #tpu.core_type<tc>, window_params = [{transform_indices = @transform_0, window_bounds = array<i64: 8, 1>}, {transform_indices = @transform_1, window_bounds = array<i64: 8, 256>}, {pipeline_mode = #tpu.pipeline_mode<synchronous>, transform_indices = @transform_2, window_bounds = array<i64: 16, 1024>}, {pipeline_mode = #tpu.pipeline_mode<synchronous>, transform_indices = @transform_3, window_bounds = array<i64: 256, 1024>}, {pipeline_mode = #tpu.pipeline_mode<synchronous>, transform_indices = @transform_4, window_bounds = array<i64: 1024, 128>}, {pipeline_mode = #tpu.pipeline_mode<synchronous>, transform_indices = @transform_5, window_bounds = array<i64: 1, 128>}, {pipeline_mode = #tpu.pipeline_mode<synchronous>, transform_indices = @transform_6, window_bounds = array<i64: 128, 128>}, {pipeline_mode = #tpu.pipeline_mode<synchronous>, transform_indices = @transform_7, window_bounds = array<i64: 1, 128>}, {transform_indices = @transform_8, window_bounds = array<i64: 8, 128>}]} {
    %c0 = arith.constant 0 : index
    %c0_0 = arith.constant 0 : index
    %0 = vector.load %arg1[%c0, %c0_0] : memref<8x1xi32, #tpu.memory_space<vmem>>, vector<8x1xi32>
    %1 = tpu.iota {dimensions = array<i32: 1>} : vector<1x16xi32>
    %2 = vector.broadcast %0 : vector<8x1xi32> to vector<8x16xi32>
    %3 = vector.broadcast %1 : vector<1x16xi32> to vector<8x16xi32>
    %4 = arith.cmpi eq, %2, %3 : vector<8x16xi32>
    %5 = arith.extui %4 : vector<8x16xi1> to vector<8x16xi32>
    %6 = arith.sitofp %5 : vector<8x16xi32> to vector<8x16xf32>
    %c0_1 = arith.constant 0 : index
    %c0_2 = arith.constant 0 : index
    %7 = vector.load %arg3[%c0_1, %c0_2] : memref<16x1024xf32, #tpu.memory_space<vmem>>, vector<16x1024xf32>
    %cst = arith.constant dense<0.000000e+00> : vector<8x1024xf32>
    %8 = tpu.matmul %6, %7, %cst {dimension_numbers = #tpu.dot_dimension_numbers<[1], [0], [0], [1], [0, 0, 1, 1], [], []>} : vector<8x16xf32>, vector<16x1024xf32>, vector<8x1024xf32> -> vector<8x1024xf32>
    %c0_3 = arith.constant 0 : index
    %c0_4 = arith.constant 0 : index
    %9 = vector.load %arg2[%c0_3, %c0_4] : memref<8x256xf32, #tpu.memory_space<vmem>>, vector<8x256xf32>
    %10 = arith.truncf %9 : vector<8x256xf32> to vector<8x256xbf16>
    %c0_5 = arith.constant 0 : index
    %c0_6 = arith.constant 0 : index
    %11 = vector.load %arg4[%c0_5, %c0_6] : memref<256x1024xbf16, #tpu.memory_space<vmem>>, vector<256x1024xbf16>
    %cst_7 = arith.constant dense<0.000000e+00> : vector<8x1024xf32>
    %12 = tpu.matmul %10, %11, %cst_7 {dimension_numbers = #tpu.dot_dimension_numbers<[1], [0], [0], [1], [0, 0, 1, 1], [], []>} : vector<8x256xbf16>, vector<256x1024xbf16>, vector<8x1024xf32> -> vector<8x1024xf32>
    %13 = arith.addf %12, %8 : vector<8x1024xf32>
    %cst_8 = arith.constant 0.000000e+00 : f32
    %14 = vector.broadcast %cst_8 : f32 to vector<8x1024xf32>
    %15 = arith.maximumf %13, %14 : vector<8x1024xf32>
    %16 = arith.truncf %15 : vector<8x1024xf32> to vector<8x1024xbf16>
    %c0_9 = arith.constant 0 : index
    %c0_10 = arith.constant 0 : index
    %17 = vector.load %arg5[%c0_9, %c0_10] : memref<1024x128xbf16, #tpu.memory_space<vmem>>, vector<1024x128xbf16>
    %cst_11 = arith.constant dense<0.000000e+00> : vector<8x128xf32>
    %18 = tpu.matmul %16, %17, %cst_11 {dimension_numbers = #tpu.dot_dimension_numbers<[1], [0], [0], [1], [0, 0, 1, 1], [], []>} : vector<8x1024xbf16>, vector<1024x128xbf16>, vector<8x128xf32> -> vector<8x128xf32>
    %c0_12 = arith.constant 0 : index
    %c0_13 = arith.constant 0 : index
    %19 = vector.load %arg6[%c0_12, %c0_13] : memref<1x128xf32, #tpu.memory_space<vmem>>, vector<1x128xf32>
    %20 = vector.broadcast %19 : vector<1x128xf32> to vector<8x128xf32>
    %21 = arith.addf %18, %20 : vector<8x128xf32>
    %cst_14 = arith.constant 0.000000e+00 : f32
    %22 = vector.broadcast %cst_14 : f32 to vector<8x128xf32>
    %23 = arith.maximumf %21, %22 : vector<8x128xf32>
    %24 = arith.truncf %23 : vector<8x128xf32> to vector<8x128xbf16>
    %c0_15 = arith.constant 0 : index
    %c0_16 = arith.constant 0 : index
    %25 = vector.load %arg7[%c0_15, %c0_16] : memref<128x128xbf16, #tpu.memory_space<vmem>>, vector<128x128xbf16>
    %cst_17 = arith.constant dense<0.000000e+00> : vector<8x128xf32>
    %26 = tpu.matmul %24, %25, %cst_17 {dimension_numbers = #tpu.dot_dimension_numbers<[1], [0], [0], [1], [0, 0, 1, 1], [], []>} : vector<8x128xbf16>, vector<128x128xbf16>, vector<8x128xf32> -> vector<8x128xf32>
    %c0_18 = arith.constant 0 : index
    %c0_19 = arith.constant 0 : index
    %27 = vector.load %arg8[%c0_18, %c0_19] : memref<1x128xf32, #tpu.memory_space<vmem>>, vector<1x128xf32>
    %28 = vector.broadcast %27 : vector<1x128xf32> to vector<8x128xf32>
    %29 = arith.addf %26, %28 : vector<8x128xf32>
    %c0_20 = arith.constant 0 : index
    %c0_21 = arith.constant 0 : index
    %30 = vector.load %arg9[%c0_20, %c0_21] : memref<8x128xf32, #tpu.memory_space<vmem>>, vector<8x128xf32>
    tpu.vector_store %arg9[%c0_20, %c0_21], %29 {strides = array<i32>} : memref<8x128xf32, #tpu.memory_space<vmem>>, vector<8x128xf32>,
    return
  }
  func.func @transform_0(%arg0: i32) -> (i32, i32) {
    %c0_i32 = arith.constant 0 : i32
    %c0_i32_0 = arith.constant 0 : i32
    return %arg0, %c0_i32 : i32, i32
  }
  func.func @transform_1(%arg0: i32) -> (i32, i32) {
    %c0_i32 = arith.constant 0 : i32
    %c0_i32_0 = arith.constant 0 : i32
    return %arg0, %c0_i32 : i32, i32
  }
  func.func @transform_2(%arg0: i32) -> (i32, i32) {
    %c0_i32 = arith.constant 0 : i32
    %c0_i32_0 = arith.constant 0 : i32
    %c0_i32_1 = arith.constant 0 : i32
    return %c0_i32, %c0_i32_0 : i32, i32
  }
  func.func @transform_3(%arg0: i32) -> (i32, i32) {
    %c0_i32 = arith.constant 0 : i32
    %c0_i32_0 = arith.constant 0 : i32
    %c0_i32_1 = arith.constant 0 : i32
    return %c0_i32, %c0_i32_0 : i32, i32
  }
  func.func @transform_4(%arg0: i32) -> (i32, i32) {
    %c0_i32 = arith.constant 0 : i32
    %c0_i32_0 = arith.constant 0 : i32
    %c0_i32_1 = arith.constant 0 : i32
    return %c0_i32, %c0_i32_0 : i32, i32
  }
  func.func @transform_5(%arg0: i32) -> (i32, i32) {
    %c0_i32 = arith.constant 0 : i32
    %c0_i32_0 = arith.constant 0 : i32
    %c0_i32_1 = arith.constant 0 : i32
    return %c0_i32, %c0_i32_0 : i32, i32
  }
  func.func @transform_6(%arg0: i32) -> (i32, i32) {
    %c0_i32 = arith.constant 0 : i32
    %c0_i32_0 = arith.constant 0 : i32
    %c0_i32_1 = arith.constant 0 : i32
    return %c0_i32, %c0_i32_0 : i32, i32
  }
  func.func @transform_7(%arg0: i32) -> (i32, i32) {
    %c0_i32 = arith.constant 0 : i32
    %c0_i32_0 = arith.constant 0 : i32
    %c0_i32_1 = arith.constant 0 : i32
    return %c0_i32, %c0_i32_0 : i32, i32
  }
  func.func @transform_8(%arg0: i32) -> (i32, i32) {
    %c0_i32 = arith.constant 0 : i32
    %c0_i32_0 = arith.constant 0 : i32
    return %arg0, %c0_i32 : i32, i32
  }
}

</mosaic_0001>

<bundles_post_ra>
// kernel: tpu_custom_call.1
= control target key start
LH: loop header
LB: loop body
LE: loop exit
PB: predicated region body
PF: predicated region fallthrough
CT: control target
= control target key end

     0   :  { %13 = vsyncpa [#allocation3], 0  ;;  %s2834_s0 = inlined_call_operand.vmem [shape: s32[8,1], index: 0, kind: input, shape index: {}]   ;;  %s2835_s1 = inlined_call_operand.hbm [shape: f32[8,256], index: 1, kind: input, shape index: {}]   ;;  %s2836_s2 = inlined_call_operand.hbm [shape: f32[16,1024], index: 2, kind: input, shape index: {}]   ;;  %s2837_s3 = inlined_call_operand.hbm [shape: bf16[256,1024], index: 3, kind: input, shape index: {}]   ;;  %s2838_s4 = inlined_call_operand.hbm [shape: bf16[1024,128], index: 4, kind: input, shape index: {}]   ;;  %s2839_s5 = inlined_call_operand.vmem [shape: f32[1,128], index: 5, kind: input, shape index: {}]   ;;  %s2840_s6 = inlined_call_operand.hbm [shape: bf16[128,128], index: 6, kind: input, shape index: {}]   ;;  %s2841_s7 = inlined_call_operand.vmem [shape: f32[1,128], index: 7, kind: input, shape index: {}]   ;;  %s2842_s8 = inlined_call_operand.hbm [shape: f32[8,128], index: 8, kind: output, shape index: {}]  }
   0x1   :  { %14 = vsyncpa [#allocation6], 0 }
   0x2   :  { %15 = vsyncpa [#allocation9], 0 }
   0x3   :  { %16 = vsyncpa [#allocation4], 0  ;;  %s2711_s27 = smov [#allocation5]  }
   0x4   :  { %s34_s28 = sshll.u32 %s2711_s27, 4  ;;  %s35_s28 = int_to_ptr.vmem [resolvable:$true] %s34_s28 }
   0x5   :  { %s2591_s29 = scalar_lea.vmem %s35_s28, 2048  ;;  %p2596_p1 = scmp.lt.s32.totalorder %s35_s28, %s35_s28 }
   0x6   :  { %p2592_p0 = scmp.ne.s32.totalorder %s35_s28, %s2591_s29  ;;  %p2597_p2 = scmp.lt.s32.totalorder %s2591_s29, %s2591_s29 }
   0x8   :  { %p2598_p3 = por %p2597_p2, %p2596_p1 }
   0xa   :  { %p2599_p4 = pnand %p2598_p3, %p2592_p0 }
   0xc   :  { %2602 = shalt.err (!%p2599_p4)
}
   0xd   :  { %s2712_s30 = smov 1024   ;;  %s2713_s9 = smov 64  }
   0xe   :  { %40 = dma.hbm_to_vmem [thread:$0]  %s2836_s2, 2048, %s35_s28, [#allocation6], %s2712_s30, %s2712_s30, %s2713_s9  }
   0xf   :  { %s2714_s12 = smov [#allocation8]  }
  0x10   :  { %s58_s13 = sshll.u32 %s2714_s12, 4  ;;  %s59_s13 = int_to_ptr.vmem [resolvable:$true] %s58_s13 }
  0x11   :  { %s2611_s14 = scalar_lea.vmem %s59_s13, 8192  ;;  %p2616_p6 = scmp.lt.s32.totalorder %s59_s13, %s59_s13 }
  0x12   :  { %p2612_p5 = scmp.ne.s32.totalorder %s59_s13, %s2611_s14  ;;  %p2617_p7 = scmp.lt.s32.totalorder %s2611_s14, %s2611_s14 }
  0x14   :  { %p2618_p8 = por %p2617_p7, %p2616_p6 }
  0x16   :  { %p2619_p9 = pnand %p2618_p8, %p2612_p5 }
  0x18   :  { %2622 = shalt.err (!%p2619_p9)
}
  0x19   :  { %s2715_s15 = smov 4   ;;  %s2716_s18 = smov [#allocation2]  }
  0x1a   :  { %64 = dma.hbm_to_vmem [thread:$0]  %s2838_s4, 8192, %s59_s13, [#allocation9], %s2713_s9, %s2713_s9, %s2715_s15  }
  0x1b   :  { %s25_s2 = sshll.u32 %s2716_s18, 4  ;;  %s2717_s19 = smov [#allocation7]   ;;  %s26_s2 = int_to_ptr.vmem [resolvable:$true] %s25_s2 }
  0x1c   :  { %s46_s20 = sshll.u32 %s2717_s19, 4  ;;  %s2631_s21 = scalar_lea.vmem %s26_s2, 256  ;;  %s47_s20 = int_to_ptr.vmem [resolvable:$true] %s46_s20 }
  0x1d   :  { %p2632_p10 = scmp.ne.s32.totalorder %s26_s2, %s2631_s21  ;;  %p2636_p11 = scmp.lt.s32.totalorder %s26_s2, %s26_s2 }
  0x1e   :  { %p2637_p12 = scmp.lt.s32.totalorder %s2631_s21, %s2631_s21 }
  0x20   :  { %p2638_p13 = por %p2637_p12, %p2636_p11 }
  0x22   :  { %p2639_p0 = pnand %p2638_p13, %p2632_p10 }
  0x24   :  { %2642 = shalt.err (!%p2639_p0)
}
  0x25   :  { %28 = dma.hbm_to_vmem [thread:$0]  %s2835_s1, 256, %s26_s2, [#allocation3]  }
  0x26   :  { %s2651_s24 = scalar_lea.vmem %s47_s20, 16384  ;;  %p2656_p2 = scmp.lt.s32.totalorder %s47_s20, %s47_s20 }
  0x27   :  { %p2652_p1 = scmp.ne.s32.totalorder %s47_s20, %s2651_s24  ;;  %p2657_p3 = scmp.lt.s32.totalorder %s2651_s24, %s2651_s24 }
  0x29   :  { %p2658_p4 = por %p2657_p3, %p2656_p2 }
  0x2b   :  { %p2659_p5 = pnand %p2658_p4, %p2652_p1 }
  0x2d   :  { %2662 = shalt.err (!%p2659_p5)
}
  0x2e   :  { %s2718_s4 = smov 512   ;;  %s2719_s25 = smov 32  }
  0x2f   :  { %52 = dma.hbm_to_vmem [thread:$0]  %s2837_s3, 16384, %s47_s20, [#allocation6], %s2718_s4, %s2718_s4, %s2719_s25  }
  0x30   :  { %s2720_s28 = smov [#allocation10]  }
  0x31   :  { %s72_s29 = sshll.u32 %s2720_s28, 4  ;;  %s73_s29 = int_to_ptr.vmem [resolvable:$true] %s72_s29 }
  0x32   :  { %s2671_s30 = scalar_lea.vmem %s73_s29, 1024  ;;  %p2676_p7 = scmp.lt.s32.totalorder %s73_s29, %s73_s29 }
  0x33   :  { %p2672_p6 = scmp.ne.s32.totalorder %s73_s29, %s2671_s30  ;;  %p2677_p8 = scmp.lt.s32.totalorder %s2671_s30, %s2671_s30 }
  0x35   :  { %p2678_p9 = por %p2677_p8, %p2676_p7 }
  0x37   :  { %p2679_p10 = pnand %p2678_p9, %p2672_p6 }
  0x39   :  { %2682 = shalt.err (!%p2679_p10)
}
  0x3a   :  { %78 = dma.hbm_to_vmem [thread:$0]  %s2840_s6, 1024, %s73_s29, [#allocation9], %s2713_s9, %s2713_s9, %s2715_s15  }
  0x3b   :  { %2703 = dma.done.wait [#allocation3], 256  }
  0x3c   :  { %2704 = vsyncadd [#allocation3], 4294967040 }
  0x3d   :  { %2705 = dma.done.wait [#allocation6], 18432  }
  0x3e   :  { %2706 = vsyncadd [#allocation6], 4294948864 }
  0x3f   :  { %2707 = dma.done.wait [#allocation9], 9216  }
  0x40   :  { %2708 = vsyncadd [#allocation9], 4294958080  ;;  %v2721_v0 = vmov 0   ;;  %v2722_v1 = vmov 0.0   ;;  %v97_v2 = vld [vmem:[%s2834_s0] sm:$0xff]  ;;  %v470_v3 = vld [vmem:[#allocation7 + $0x1c0] sm:$0xff] }
  0x41   :  { %2510 = vset.pattern.permute.xlu0 %v2721_v0  ;;  %190 = vmatprep.mubr.f32.mxu1 %v2722_v1  ;;  %v474_v4 = vld [vmem:[#allocation7 + $0x1e0] sm:$0xff]  ;;  %v411_v20 = vld [vmem:[#allocation2 + $0x8] sm:$0xff]  ;;  %v115_v31 = vld [vmem:[#allocation5 + $0x48] sm:$0xff]  ;;  %vm122_vm0 = vcmask 130048   ;;  %vm2723_vm2 = vmmov 0  }
  0x42   :  { %101 = vperm.xlu0 %2510, %v97_v2   ;;  %v2234_v5 = vcombine.high %v470_v3, %v474_v4  ;;  %v2233_v6 = vcombine.low %v470_v3, %v474_v4  ;;  %v462_v7 = vld [vmem:[#allocation7 + $0x180] sm:$0xff]  ;;  %v2796_v22 = vpack.c.bf16 %v411_v20, %v411_v20  ;;  %154 = vmatprep.subr.mxu1 %v115_v31  ;;  %v107_v35 = vld [vmem:[#allocation5 + $0x8] sm:$0xff]  ;;  %v117_v38 = vld [vmem:[#allocation5 + $0x58] sm:$0xff] }
  0x43   :  { %v466_v8 = vld [vmem:[#allocation7 + $0x1a0] sm:$0xff]  ;;  %v460_v20 = vld [vmem:[#allocation7 + $0x170] sm:$0xff] }
  0x44   :  { %v2226_v9 = vcombine.high %v462_v7, %v466_v8  ;;  %v454_v10 = vld [vmem:[#allocation7 + $0x140] sm:$0xff]  ;;  %1182 = vmatprep.subr.bf16.mxu0 %v2234_v5  ;;  %v2225_v12 = vcombine.low %v462_v7, %v466_v8  ;;  %1214 = vmatprep.mubr.bf16.mxu0 %v2796_v22 }
  0x45   :  { %v458_v11 = vld [vmem:[#allocation7 + $0x160] sm:$0xff]  ;;  %1183 = vmatpush1.bf16.msra.mxu0 %v2233_v6 }
  0x46   :  { %1184 = vmatprep.subr.bf16.mxu0 %v2226_v9  ;;  %v2218_v13 = vcombine.high %v454_v10, %v458_v11  ;;  %v446_v14 = vld [vmem:[#allocation7 + $0x100] sm:$0xff]  ;;  %v2217_v16 = vcombine.low %v454_v10, %v458_v11  ;;  %v472_v9 = vld [vmem:[#allocation7 + $0x1d0] sm:$0xff] }
  0x47   :  { %v450_v15 = vld [vmem:[#allocation7 + $0x120] sm:$0xff]  ;;  %v476_v10 = vld [vmem:[#allocation7 + $0x1f0] sm:$0xff] }
  0x48   :  { %v2210_v17 = vcombine.high %v446_v14, %v450_v15  ;;  %v438_v18 = vld [vmem:[#allocation7 + $0xc0] sm:$0xff]  ;;  %v2209_v21 = vcombine.low %v446_v14, %v450_v15  ;;  %v464_v14 = vld [vmem:[#allocation7 + $0x190] sm:$0xff] }
  0x49   :  { %1185 = vmatpush1.bf16.msra.mxu0 %v2225_v12  ;;  %v442_v19 = vld [vmem:[#allocation7 + $0xe0] sm:$0xff]  ;;  %v410_v12 = vld [vmem:[#allocation2] sm:$0xff] }
  0x4a   :  { %1186 = vmatprep.subr.bf16.mxu0 %v2218_v13  ;;  %v2202_v23 = vcombine.high %v438_v18, %v442_v19  ;;  %v430_v24 = vld [vmem:[#allocation7 + $0x80] sm:$0xff]  ;;  %v2201_v26 = vcombine.low %v438_v18, %v442_v19  ;;  %v468_v15 = vld [vmem:[#allocation7 + $0x1b0] sm:$0xff]  ;;  %v2237_v18 = vcombine.low %v472_v9, %v476_v10 }
  0x4b   :  { %v434_v25 = vld [vmem:[#allocation7 + $0xa0] sm:$0xff]  ;;  %v456_v19 = vld [vmem:[#allocation7 + $0x150] sm:$0xff] }
  0x4c   :  { %v2194_v27 = vcombine.high %v430_v24, %v434_v25  ;;  %v422_v28 = vld [vmem:[#allocation7 + $0x40] sm:$0xff]  ;;  %v2193_v30 = vcombine.low %v430_v24, %v434_v25  ;;  %v448_v24 = vld [vmem:[#allocation7 + $0x110] sm:$0xff] }
  0x4d   :  { %1187 = vmatpush1.bf16.msra.mxu0 %v2217_v16  ;;  %v426_v29 = vld [vmem:[#allocation7 + $0x60] sm:$0xff]  ;;  %v2238_v16 = vcombine.high %v472_v9, %v476_v10  ;;  %v452_v25 = vld [vmem:[#allocation7 + $0x130] sm:$0xff]  ;;  %v98_v9 = vlaneseq }
  0x4e   :  { %1188 = vmatprep.subr.bf16.mxu0 %v2210_v17  ;;  %v114_v32 = vld [vmem:[#allocation5 + $0x40] sm:$0xff]  ;;  %v2186_v33 = vcombine.high %v422_v28, %v426_v29  ;;  %v2185_v39 = vcombine.low %v422_v28, %v426_v29  ;;  %v2799_v17 = vpack.c.bf16 %v410_v12, %v410_v12  ;;  %v440_v28 = vld [vmem:[#allocation7 + $0xd0] sm:$0xff]  ;;  %v2213_v31 = vcombine.low %v448_v24, %v452_v25 }
  0x4f   :  { %v414_v34 = vld [vmem:[#allocation7] sm:$0xff]  ;;  %155 = vmatpush1.msra.mxu1 %v114_v32  ;;  %v444_v29 = vld [vmem:[#allocation7 + $0xf0] sm:$0xff] }
  0x50   :  { %v418_v36 = vld [vmem:[#allocation7 + $0x20] sm:$0xff]  ;;  %156 = vmatprep.subr.mxu1 %v107_v35  ;;  %v432_v32 = vld [vmem:[#allocation7 + $0x90] sm:$0xff]  ;;  %v2205_v35 = vcombine.low %v440_v28, %v444_v29 }
  0x51   :  { %1189 = vmatpush1.bf16.msra.mxu0 %v2209_v21  ;;  %v106_v37 = vld [vmem:[#allocation5] sm:$0xff]  ;;  %v2178_v40 = vcombine.high %v414_v34, %v418_v36  ;;  %v2177_v43 = vcombine.low %v414_v34, %v418_v36  ;;  %v2230_v21 = vcombine.high %v464_v14, %v468_v15  ;;  %v2206_v34 = vcombine.high %v440_v28, %v444_v29  ;;  %v424_v36 = vld [vmem:[#allocation7 + $0x50] sm:$0xff]  ;;  %v121_v28 = vld [vmem:[#allocation5 + $0x78] sm:$0xff] }
  0x52   :  { %1190 = vmatprep.subr.bf16.mxu0 %v2202_v23  ;;  %157 = vmatpush1.msra.mxu1 %v106_v37  ;;  %v534_v41 = vld [vmem:[#allocation7 + $0x3c0] sm:$0xff]  ;;  %v2229_v23 = vcombine.low %v464_v14, %v468_v15  ;;  %v428_v37 = vld [vmem:[#allocation7 + $0x70] sm:$0xff]  ;;  %v99_v14 = vand.u32 127, %v98_v9  ;;  %v471_v29 = vld [vmem:[#allocation7 + $0x1c8] sm:$0xff] }
  0x53   :  { %225 = vmatprep.subr.mxu1 %v117_v38  ;;  %v538_v42 = vld [vmem:[#allocation7 + $0x3e0] sm:$0xff]  ;;  %v484_v12 = vld [vmem:[#allocation7 + $0x230] sm:$0xff] }
  0x54   :  { %v2298_v44 = vcombine.high %v534_v41, %v538_v42  ;;  %v526_v45 = vld [vmem:[#allocation7 + $0x380] sm:$0xff]  ;;  %v2297_v47 = vcombine.low %v534_v41, %v538_v42  ;;  %v420_v41 = vld [vmem:[#allocation7 + $0x30] sm:$0xff]  ;;  %v2190_v42 = vcombine.high %v424_v36, %v428_v37 }
  0x55   :  { %1191 = vmatpush1.bf16.msra.mxu0 %v2201_v26  ;;  %v530_v46 = vld [vmem:[#allocation7 + $0x3a0] sm:$0xff]  ;;  %v2222_v26 = vcombine.high %v456_v19, %v460_v20  ;;  %v2522_v9 = vld [vmem:[#allocation8 + $0x10] sm:$0xff]  }
  0x56   :  { %1192 = vmatprep.subr.bf16.mxu0 %v2194_v27  ;;  %v518_v48 = vld [vmem:[#allocation7 + $0x340] sm:$0xff]  ;;  %v2290_v50 = vcombine.high %v526_v45, %v530_v46  ;;  %v2289_v51 = vcombine.low %v526_v45, %v530_v46  ;;  %v2221_v27 = vcombine.low %v456_v19, %v460_v20  ;;  %v536_v45 = vld [vmem:[#allocation7 + $0x3d0] sm:$0xff] }
  0x57   :  { %v522_v49 = vld [vmem:[#allocation7 + $0x360] sm:$0xff]  ;;  %v540_v46 = vld [vmem:[#allocation7 + $0x3f0] sm:$0xff] }
  0x58   :  { %v510_v52 = vld [vmem:[#allocation7 + $0x300] sm:$0xff]  ;;  %v2282_v54 = vcombine.high %v518_v48, %v522_v49  ;;  %v2281_v55 = vcombine.low %v518_v48, %v522_v49  ;;  %v2302_v48 = vcombine.high %v536_v45, %v540_v46  ;;  %v528_v49 = vld [vmem:[#allocation7 + $0x390] sm:$0xff] }
  0x59   :  { %1193 = vmatpush1.bf16.msra.mxu0 %v2193_v30  ;;  %v514_v53 = vld [vmem:[#allocation7 + $0x320] sm:$0xff]  ;;  %v2214_v30 = vcombine.high %v448_v24, %v452_v25  ;;  %v119_v24 = vld [vmem:[#allocation5 + $0x68] sm:$0xff] }
  0x5a   :  { %1194 = vmatprep.subr.bf16.mxu0 %v2186_v33  ;;  %v502_v56 = vld [vmem:[#allocation7 + $0x2c0] sm:$0xff]  ;;  %v2274_v58 = vcombine.high %v510_v52, %v514_v53  ;;  %v2273_v59 = vcombine.low %v510_v52, %v514_v53  ;;  %v436_v33 = vld [vmem:[#allocation7 + $0xb0] sm:$0xff] }
  0x5b   :  { %v506_v57 = vld [vmem:[#allocation7 + $0x2e0] sm:$0xff]  ;;  %v2198_v38 = vcombine.high %v432_v32, %v436_v33  ;;  %v520_v53 = vld [vmem:[#allocation7 + $0x350] sm:$0xff] }
  0x5c   :  { %v494_v60 = vld [vmem:[#allocation7 + $0x280] sm:$0xff]  ;;  %v2266_v62 = vcombine.high %v502_v56, %v506_v57  ;;  %v2265_v63 = vcombine.low %v502_v56, %v506_v57  ;;  %v512_v57 = vld [vmem:[#allocation7 + $0x310] sm:$0xff] }
  0x5d   :  { %1195 = vmatpush1.bf16.msra.mxu0 %v2185_v39  ;;  %v498_v61 = vld [vmem:[#allocation7 + $0x2a0] sm:$0xff]  ;;  %v2197_v39 = vcombine.low %v432_v32, %v436_v33  ;;  %v113_v32 = vld [vmem:[#allocation5 + $0x38] sm:$0xff]  ;;  %v463_v33 = vld [vmem:[#allocation7 + $0x188] sm:$0xff] }
  0x5e   :  { %1196 = vmatprep.subr.bf16.mxu0 %v2178_v40  ;;  %v486_v0 = vld [vmem:[#allocation7 + $0x240] sm:$0xff]  ;;  %v2258_v3 = vcombine.high %v494_v60, %v498_v61  ;;  %v2257_v4 = vcombine.low %v494_v60, %v498_v61  ;;  %v416_v40 = vld [vmem:[#allocation7 + $0x10] sm:$0xff] }
  0x5f   :  { %v490_v2 = vld [vmem:[#allocation7 + $0x260] sm:$0xff]  ;;  %v504_v61 = vld [vmem:[#allocation7 + $0x2d0] sm:$0xff] }
  0x60   :  { %v478_v5 = vld [vmem:[#allocation7 + $0x200] sm:$0xff]  ;;  %v2250_v7 = vcombine.high %v486_v0, %v490_v2  ;;  %v2249_v8 = vcombine.low %v486_v0, %v490_v2  ;;  %v496_v2 = vld [vmem:[#allocation7 + $0x290] sm:$0xff] }
  0x61   :  { %1197 = vmatpush1.bf16.msra.mxu0 %v2177_v43  ;;  %v482_v6 = vld [vmem:[#allocation7 + $0x220] sm:$0xff]  ;;  %v2189_v43 = vcombine.low %v424_v36, %v428_v37 }
  0x62   :  { %1198 = vmatprep.subr.bf16.mxu0 %v2298_v44  ;;  %v2242_v11 = vcombine.high %v478_v5, %v482_v6  ;;  %v2241_v13 = vcombine.low %v478_v5, %v482_v6  ;;  %v2182_v44 = vcombine.high %v416_v40, %v420_v41  ;;  %v488_v6 = vld [vmem:[#allocation7 + $0x250] sm:$0xff]  ;;  %v118_v25 = vld [vmem:[#allocation5 + $0x60] sm:$0xff] }
  0x65   :  { %1199 = vmatpush2.bf16.msra.mxu0 %v2297_v47  ;;  %v2181_v47 = vcombine.low %v416_v40, %v420_v41  ;;  %v459_v40 = vld [vmem:[#allocation7 + $0x168] sm:$0xff]  ;;  %v2511_v41 = vld [vmem:[#allocation8 + $0x78] sm:$0xff]  }
  0x66   :  { %1200 = vmatprep.subr.bf16.mxu0 %v2290_v50  ;;  %v532_v50 = vld [vmem:[#allocation7 + $0x3b0] sm:$0xff] }
  0x67   :  { %v2294_v52 = vcombine.high %v528_v49, %v532_v50 }
  0x69   :  { %1201 = vmatpush2.bf16.msra.mxu0 %v2289_v51  ;;  %v2301_v51 = vcombine.low %v536_v45, %v540_v46  ;;  %v447_v46 = vld [vmem:[#allocation7 + $0x108] sm:$0xff] }
  0x6a   :  { %1202 = vmatprep.subr.bf16.mxu0 %v2282_v54  ;;  %v524_v54 = vld [vmem:[#allocation7 + $0x370] sm:$0xff] }
  0x6b   :  { %v2286_v56 = vcombine.high %v520_v53, %v524_v54 }
  0x6d   :  { %1203 = vmatpush2.bf16.msra.mxu0 %v2281_v55  ;;  %v2293_v55 = vcombine.low %v528_v49, %v532_v50  ;;  %v2515_v49 = vld [vmem:[#allocation8 + $0x68] sm:$0xff]  }
  0x6e   :  { %1204 = vmatprep.subr.bf16.mxu0 %v2274_v58  ;;  %v516_v58 = vld [vmem:[#allocation7 + $0x330] sm:$0xff] }
  0x6f   :  { %v2278_v60 = vcombine.high %v512_v57, %v516_v58 }
  0x71   :  { %1205 = vmatpush2.bf16.msra.mxu0 %v2273_v59  ;;  %v2285_v59 = vcombine.low %v520_v53, %v524_v54  ;;  %v443_v53 = vld [vmem:[#allocation7 + $0xe8] sm:$0xff] }
  0x72   :  { %1206 = vmatprep.subr.bf16.mxu0 %v2266_v62  ;;  %v508_v62 = vld [vmem:[#allocation7 + $0x2f0] sm:$0xff]  ;;  %v2516_v54 = vld [vmem:[#allocation8 + $0x28] sm:$0xff]  }
  0x73   :  { %v2270_v0 = vcombine.high %v504_v61, %v508_v62 }
  0x75   :  { %1207 = vmatpush2.bf16.msra.mxu0 %v2265_v63  ;;  %v2277_v63 = vcombine.low %v512_v57, %v516_v58  ;;  %v431_v58 = vld [vmem:[#allocation7 + $0x88] sm:$0xff] }
  0x76   :  { %1208 = vmatprep.subr.bf16.mxu0 %v2258_v3  ;;  %v500_v3 = vld [vmem:[#allocation7 + $0x2b0] sm:$0xff] }
  0x77   :  { %v2262_v5 = vcombine.high %v496_v2, %v500_v3 }
  0x79   :  { %1209 = vmatpush2.bf16.msra.mxu0 %v2257_v4  ;;  %v2269_v4 = vcombine.low %v504_v61, %v508_v62  ;;  %v2519_v61 = vld [vmem:[#allocation8 + $0x58] sm:$0xff]  }
  0x7a   :  { %1210 = vmatprep.subr.bf16.mxu0 %v2250_v7  ;;  %v492_v7 = vld [vmem:[#allocation7 + $0x270] sm:$0xff] }
  0x7b   :  { %v2254_v10 = vcombine.high %v488_v6, %v492_v7 }
  0x7d   :  { %1211 = vmatpush2.bf16.msra.mxu0 %v2249_v8  ;;  %v2261_v8 = vcombine.low %v496_v2, %v500_v3  ;;  %v427_v2 = vld [vmem:[#allocation7 + $0x68] sm:$0xff]  ;;  %v2520_v3 = vld [vmem:[#allocation8 + $0x18] sm:$0xff]  }
  0x7e   :  { %1212 = vmatprep.subr.bf16.mxu0 %v2242_v11  ;;  %v480_v11 = vld [vmem:[#allocation7 + $0x210] sm:$0xff] }
  0x7f   :  { %v2246_v15 = vcombine.high %v480_v11, %v484_v12  ;;  %v2245_v19 = vcombine.low %v480_v11, %v484_v12  ;;  %v535_v12 = vld [vmem:[#allocation7 + $0x3c8] sm:$0xff] }
  0x81   :  { %1213 = vmatpush2.bf16.msra.mxu0 %v2241_v13  ;;  %v2253_v13 = vcombine.low %v488_v6, %v492_v7  ;;  %v415_v7 = vld [vmem:[#allocation7 + $0x8] sm:$0xff] }
  0x82   :  { %1264 = vmatprep.subr.bf16.mxu0 %v2238_v16 }
  0x84   :  { %1215 = vmatmul.mubr.bf16.vlgmr.msra.gmra.mxu0 %v2799_v17 }
  0x85   :  { %1265 = vmatpush1.bf16.msra.mxu0 %v2237_v18  ;;  %1296 = vmatprep.mubr.bf16.mxu0 %v2796_v22  ;;  %v116_v18 = vld [vmem:[#allocation5 + $0x50] sm:$0xff] }
  0x86   :  { %1266 = vmatprep.subr.bf16.mxu0 %v2230_v21  ;;  %v109_v21 = vld [vmem:[#allocation5 + $0x18] sm:$0xff] }
  0x89   :  { %1267 = vmatpush1.bf16.msra.mxu0 %v2229_v23  ;;  %v108_v23 = vld [vmem:[#allocation5 + $0x10] sm:$0xff] }
  0x8a   :  { %1268 = vmatprep.subr.bf16.mxu0 %v2222_v26  ;;  %v111_v26 = vld [vmem:[#allocation5 + $0x28] sm:$0xff] }
  0x8d   :  { %1269 = vmatpush1.bf16.msra.mxu0 %v2221_v27  ;;  %v110_v27 = vld [vmem:[#allocation5 + $0x20] sm:$0xff] }
  0x8e   :  { %1270 = vmatprep.subr.bf16.mxu0 %v2214_v30  ;;  %v475_v30 = vld [vmem:[#allocation7 + $0x1e8] sm:$0xff] }
  0x8f   :  { %v2236_v36 = vcombine.high %v471_v29, %v475_v30  ;;  %v2235_v37 = vcombine.low %v471_v29, %v475_v30  ;;  %v503_v30 = vld [vmem:[#allocation7 + $0x2c8] sm:$0xff] }
  0x91   :  { %1271 = vmatpush1.bf16.msra.mxu0 %v2213_v31  ;;  %v120_v31 = vld [vmem:[#allocation5 + $0x70] sm:$0xff] }
  0x92   :  { %1272 = vmatprep.subr.bf16.mxu0 %v2206_v34  ;;  %v467_v34 = vld [vmem:[#allocation7 + $0x1a8] sm:$0xff] }
  0x95   :  { %1273 = vmatpush1.bf16.msra.mxu0 %v2205_v35  ;;  %v112_v35 = vld [vmem:[#allocation5 + $0x30] sm:$0xff] }
  0x96   :  { %1274 = vmatprep.subr.bf16.mxu0 %v2198_v38  ;;  %v2228_v38 = vcombine.high %v463_v33, %v467_v34 }
  0x99   :  { %1275 = vmatpush1.bf16.msra.mxu0 %v2197_v39  ;;  %v455_v39 = vld [vmem:[#allocation7 + $0x148] sm:$0xff] }
  0x9a   :  { %1276 = vmatprep.subr.bf16.mxu0 %v2190_v42  ;;  %v2512_v42 = vld [vmem:[#allocation8 + $0x38] sm:$0xff]   ;;  %v2220_v45 = vcombine.high %v455_v39, %v459_v40  ;;  %v2219_v50 = vcombine.low %v455_v39, %v459_v40  ;;  %v491_v39 = vld [vmem:[#allocation7 + $0x268] sm:$0xff] }
  0x9d   :  { %1277 = vmatpush1.bf16.msra.mxu0 %v2189_v43  ;;  %v2513_v43 = vld [vmem:[#allocation8 + $0x70] sm:$0xff]  }
  0x9e   :  { %1278 = vmatprep.subr.bf16.mxu0 %v2182_v44  ;;  %v2227_v44 = vcombine.low %v463_v33, %v467_v34  ;;  %v495_v34 = vld [vmem:[#allocation7 + $0x288] sm:$0xff] }
  0xa1   :  { %1279 = vmatpush1.bf16.msra.mxu0 %v2181_v47  ;;  %v451_v47 = vld [vmem:[#allocation7 + $0x128] sm:$0xff] }
  0xa2   :  { %1280 = vmatprep.subr.bf16.mxu0 %v2302_v48  ;;  %v2514_v48 = vld [vmem:[#allocation8 + $0x30] sm:$0xff]  }
  0xa5   :  { %1281 = vmatpush2.bf16.msra.mxu0 %v2301_v51  ;;  %v2212_v51 = vcombine.high %v447_v46, %v451_v47 }
  0xa6   :  { %1282 = vmatprep.subr.bf16.mxu0 %v2294_v52  ;;  %v439_v52 = vld [vmem:[#allocation7 + $0xc8] sm:$0xff] }
  0xa7   :  { %v2204_v57 = vcombine.high %v439_v52, %v443_v53  ;;  %v2203_v62 = vcombine.low %v439_v52, %v443_v53  ;;  %v2526_v52 = vld [vmem:[#allocation8] sm:$0xff]  }
  0xa9   :  { %1283 = vmatpush2.bf16.msra.mxu0 %v2293_v55  ;;  %v2517_v55 = vld [vmem:[#allocation8 + $0x60] sm:$0xff]  }
  0xaa   :  { %1284 = vmatprep.subr.bf16.mxu0 %v2286_v56  ;;  %v2211_v56 = vcombine.low %v447_v46, %v451_v47  ;;  %v2524_v46 = vld [vmem:[#allocation8 + $0x8] sm:$0xff]  }
  0xad   :  { %1285 = vmatpush2.bf16.msra.mxu0 %v2285_v59  ;;  %v435_v59 = vld [vmem:[#allocation7 + $0xa8] sm:$0xff] }
  0xae   :  { %1286 = vmatprep.subr.bf16.mxu0 %v2278_v60  ;;  %v2518_v60 = vld [vmem:[#allocation8 + $0x20] sm:$0xff]  }
  0xb1   :  { %1287 = vmatpush2.bf16.msra.mxu0 %v2277_v63  ;;  %v2196_v63 = vcombine.high %v431_v58, %v435_v59 }
  0xb2   :  { %1288 = vmatprep.subr.bf16.mxu0 %v2270_v0  ;;  %v423_v0 = vld [vmem:[#allocation7 + $0x48] sm:$0xff] }
  0xb3   :  { %v2188_v6 = vcombine.high %v423_v0, %v427_v2 }
  0xb5   :  { %1289 = vmatpush2.bf16.msra.mxu0 %v2269_v4  ;;  %v2521_v4 = vld [vmem:[#allocation8 + $0x50] sm:$0xff]  }
  0xb6   :  { %1290 = vmatprep.subr.bf16.mxu0 %v2262_v5  ;;  %v2195_v5 = vcombine.low %v431_v58, %v435_v59  ;;  %v457_v59 = vld [vmem:[#allocation7 + $0x158] sm:$0xff] }
  0xb9   :  { %1291 = vmatpush2.bf16.msra.mxu0 %v2261_v8  ;;  %v419_v8 = vld [vmem:[#allocation7 + $0x28] sm:$0xff] }
  0xba   :  { %1292 = vmatprep.subr.bf16.mxu0 %v2254_v10  ;;  %v2187_v10 = vcombine.low %v423_v0, %v427_v2  ;;  %v2180_v11 = vcombine.high %v415_v7, %v419_v8  ;;  %v453_v0 = vld [vmem:[#allocation7 + $0x138] sm:$0xff] }
  0xbd   :  { %v102_v16 = vpop.permute.xlu0 %101  ;;  %1293 = vmatpush2.bf16.msra.mxu0 %v2253_v13  ;;  %v539_v13 = vld [vmem:[#allocation7 + $0x3e8] sm:$0xff] }
  0xbe   :  { %vm103_vm1 = vcmp.eq.s32.totalorder %v102_v16, %v99_v14  ;;  %1294 = vmatprep.subr.bf16.mxu0 %v2246_v15  ;;  %v2179_v14 = vcombine.low %v415_v7, %v419_v8  ;;  %v2300_v15 = vcombine.high %v535_v12, %v539_v13  ;;  %v527_v16 = vld [vmem:[#allocation7 + $0x388] sm:$0xff]  ;;  %v433_v8 = vld [vmem:[#allocation7 + $0x98] sm:$0xff] }
  0xbf   :  { %v2172_v20 = vsel %vm103_vm1, 1.0, %v2722_v1 }
  0xc0   :  { %2173 = vmatmul.mubr.msk.f32.vlgmr.msra.gmra.mxu1 %vm122_vm0, %v2172_v20 }
  0xc1   :  { %226 = vmatpush1.msra.mxu1 %v116_v18  ;;  %261 = vmatprep.mubr.f32.mxu1 %v2722_v1  ;;  %v531_v18 = vld [vmem:[#allocation7 + $0x3a8] sm:$0xff] }
  0xc2   :  { %227 = vmatprep.subr.mxu1 %v109_v21  ;;  %1295 = vmatpush2.bf16.msra.mxu0 %v2245_v19  ;;  %v2299_v19 = vcombine.low %v535_v12, %v539_v13  ;;  %v519_v21 = vld [vmem:[#allocation7 + $0x348] sm:$0xff]  ;;  %v429_v12 = vld [vmem:[#allocation7 + $0x78] sm:$0xff] }
  0xc3   :  { %228 = vmatpush1.msra.mxu1 %v108_v23  ;;  %2379 = vmatprep.subr.bf16.mxu0 %v2511_v41  ;;  %v523_v23 = vld [vmem:[#allocation7 + $0x368] sm:$0xff] }
  0xc4   :  { %296 = vmatprep.subr.mxu1 %v119_v24  ;;  %2174 = vmatmul.mubr.msk.f32.vlgmr.msra.gmra.mxu1 %vm122_vm0, %v2172_v20  ;;  %v2291_v24 = vcombine.low %v527_v16, %v531_v18 }
  0xc5   :  { %297 = vmatpush1.msra.mxu1 %v118_v25  ;;  %332 = vmatprep.mubr.f32.mxu1 %v2722_v1  ;;  %v2284_v25 = vcombine.high %v519_v21, %v523_v23 }
  0xc6   :  { %298 = vmatprep.subr.mxu1 %v111_v26  ;;  %1297 = vmatmul.mubr.bf16.vlgmr.msra.gmra.mxu0 %v2799_v17  ;;  %v511_v26 = vld [vmem:[#allocation7 + $0x308] sm:$0xff] }
  0xc7   :  { %299 = vmatpush1.msra.mxu1 %v110_v27  ;;  %2380 = vmatpush3.bf16.msra.mxu0 %v2512_v42  ;;  %v515_v27 = vld [vmem:[#allocation7 + $0x328] sm:$0xff] }
  0xc8   :  { %367 = vmatprep.subr.mxu1 %v121_v28  ;;  %2175 = vmatmul.mubr.msk.f32.vlgmr.msra.gmra.mxu1 %vm122_vm0, %v2172_v20  ;;  %v2283_v28 = vcombine.low %v519_v21, %v523_v23  ;;  %v2276_v29 = vcombine.high %v511_v26, %v515_v27  ;;  %v479_v42 = vld [vmem:[#allocation7 + $0x208] sm:$0xff]  ;;  %v541_v21 = vld [vmem:[#allocation7 + $0x3f8] sm:$0xff] }
  0xc9   :  { %368 = vmatpush1.msra.mxu1 %v120_v31  ;;  %403 = vmatprep.mubr.f32.mxu1 %v2722_v1  ;;  %v507_v31 = vld [vmem:[#allocation7 + $0x2e8] sm:$0xff] }
  0xca   :  { %369 = vmatprep.subr.mxu1 %v113_v32  ;;  %2381 = vmatprep.subr.bf16.mxu0 %v2513_v43  ;;  %v2275_v32 = vcombine.low %v511_v26, %v515_v27  ;;  %v2268_v33 = vcombine.high %v503_v30, %v507_v31  ;;  %v483_v43 = vld [vmem:[#allocation7 + $0x228] sm:$0xff]  ;;  %v533_v26 = vld [vmem:[#allocation7 + $0x3b8] sm:$0xff] }
  0xcb   :  { %370 = vmatpush1.msra.mxu1 %v112_v35  ;;  %2382 = vmatpush3.bf16.msra.mxu0 %v2514_v48  ;;  %v499_v35 = vld [vmem:[#allocation7 + $0x2a8] sm:$0xff]  ;;  %v2244_v47 = vcombine.high %v479_v42, %v483_v43  ;;  %v473_v48 = vld [vmem:[#allocation7 + $0x1d8] sm:$0xff] }
  0xcc   :  { %1223 = vmatprep.subr.bf16.mxu1 %v2236_v36  ;;  %2176 = vmatmul.mubr.msk.f32.vlgmr.msra.gmra.mxu1 %vm122_vm0, %v2172_v20  ;;  %v2292_v20 = vcombine.high %v527_v16, %v531_v18  ;;  %v2267_v36 = vcombine.low %v503_v30, %v507_v31  ;;  %v2259_v40 = vcombine.low %v495_v34, %v499_v35  ;;  %v421_v16 = vld [vmem:[#allocation7 + $0x38] sm:$0xff] }
  0xcd   :  { %1224 = vmatpush1.bf16.msra.mxu1 %v2235_v37  ;;  %1255 = vmatprep.mubr.bf16.mxu1 %v2796_v22  ;;  %v2260_v37 = vcombine.high %v495_v34, %v499_v35  ;;  %v525_v30 = vld [vmem:[#allocation7 + $0x378] sm:$0xff] }
  0xce   :  { %1225 = vmatprep.subr.bf16.mxu1 %v2228_v38  ;;  %2383 = vmatprep.subr.bf16.mxu0 %v2515_v49  ;;  %v487_v38 = vld [vmem:[#allocation7 + $0x248] sm:$0xff]  ;;  %v477_v49 = vld [vmem:[#allocation7 + $0x1f8] sm:$0xff] }
  0xcf   :  { %2384 = vmatpush3.bf16.msra.mxu0 %v2516_v54  ;;  %v2252_v41 = vcombine.high %v487_v38, %v491_v39  ;;  %v2240_v53 = vcombine.high %v473_v48, %v477_v49  ;;  %v465_v54 = vld [vmem:[#allocation7 + $0x198] sm:$0xff] }
  0xd0   :  { %2385 = vmatprep.subr.bf16.mxu0 %v2517_v55  ;;  %v469_v55 = vld [vmem:[#allocation7 + $0x1b8] sm:$0xff] }
  0xd1   :  { %1226 = vmatpush1.bf16.msra.mxu1 %v2227_v44  ;;  %v2523_v44 = vld [vmem:[#allocation8 + $0x48] sm:$0xff]   ;;  %v2232_v58 = vcombine.high %v465_v54, %v469_v55  ;;  %v517_v34 = vld [vmem:[#allocation7 + $0x338] sm:$0xff] }
  0xd2   :  { %1227 = vmatprep.subr.bf16.mxu1 %v2220_v45  ;;  %v2251_v45 = vcombine.low %v487_v38, %v491_v39  ;;  %v509_v38 = vld [vmem:[#allocation7 + $0x2f8] sm:$0xff] }
  0xd3   :  { %2386 = vmatpush3.bf16.msra.mxu0 %v2518_v60  ;;  %v461_v60 = vld [vmem:[#allocation7 + $0x178] sm:$0xff] }
  0xd4   :  { %2387 = vmatprep.subr.bf16.mxu0 %v2519_v61  ;;  %v2231_v61 = vcombine.low %v465_v54, %v469_v55  ;;  %v2223_v2 = vcombine.low %v457_v59, %v461_v60 }
  0xd5   :  { %1228 = vmatpush1.bf16.msra.mxu1 %v2219_v50  ;;  %v2525_v50 = vld [vmem:[#allocation8 + $0x40] sm:$0xff]  }
  0xd6   :  { %1229 = vmatprep.subr.bf16.mxu1 %v2212_v51  ;;  %v2243_v51 = vcombine.low %v479_v42, %v483_v43  ;;  %v501_v42 = vld [vmem:[#allocation7 + $0x2b8] sm:$0xff] }
  0xd7   :  { %2388 = vmatpush3.bf16.msra.mxu0 %v2520_v3 }
  0xd8   :  { %2389 = vmatprep.subr.bf16.mxu0 %v2521_v4  ;;  %v441_v4 = vld [vmem:[#allocation7 + $0xd8] sm:$0xff] }
  0xd9   :  { %1230 = vmatpush1.bf16.msra.mxu1 %v2211_v56  ;;  %v2527_v56 = vld [vmem:[#allocation8 + $0x178] sm:$0xff]  }
  0xda   :  { %1231 = vmatprep.subr.bf16.mxu1 %v2204_v57  ;;  %v2239_v57 = vcombine.low %v473_v48, %v477_v49  ;;  %v481_v49 = vld [vmem:[#allocation7 + $0x218] sm:$0xff] }
  0xdb   :  { %2390 = vmatpush3.bf16.msra.mxu0 %v2522_v9  ;;  %v437_v9 = vld [vmem:[#allocation7 + $0xb8] sm:$0xff] }
  0xdc   :  { %2391 = vmatprep.subr.bf16.mxu0 %v2523_v44  ;;  %v2199_v13 = vcombine.low %v433_v8, %v437_v9 }
  0xdd   :  { %1232 = vmatpush1.bf16.msra.mxu1 %v2203_v62  ;;  %v2224_v62 = vcombine.high %v457_v59, %v461_v60  ;;  %v2545_v60 = vld [vmem:[#allocation8 + $0xf0] sm:$0xff]  }
  0xde   :  { %1233 = vmatprep.subr.bf16.mxu1 %v2196_v63  ;;  %v449_v63 = vld [vmem:[#allocation7 + $0x118] sm:$0xff] }
  0xdf   :  { %2392 = vmatpush3.bf16.msra.mxu0 %v2524_v46  ;;  %v2216_v3 = vcombine.high %v449_v63, %v453_v0  ;;  %v493_v46 = vld [vmem:[#allocation7 + $0x278] sm:$0xff] }
  0xe0   :  { %2393 = vmatprep.subr.bf16.mxu0 %v2525_v50  ;;  %v485_v50 = vld [vmem:[#allocation7 + $0x238] sm:$0xff] }
  0xe1   :  { %1234 = vmatpush1.bf16.msra.mxu1 %v2195_v5  ;;  %v445_v5 = vld [vmem:[#allocation7 + $0xf8] sm:$0xff]  ;;  %v2247_v54 = vcombine.low %v481_v49, %v485_v50 }
  0xe2   :  { %1235 = vmatprep.subr.bf16.mxu1 %v2188_v6  ;;  %v2215_v6 = vcombine.low %v449_v63, %v453_v0  ;;  %v2208_v7 = vcombine.high %v441_v4, %v445_v5  ;;  %v2548_v63 = vld [vmem:[#allocation8 + $0xa8] sm:$0xff]   ;;  %v2549_v0 = vld [vmem:[#allocation8 + $0xe0] sm:$0xff]  }
  0xe3   :  { %2394 = vmatpush3.bf16.msra.mxu0 %v2526_v52  ;;  %v2248_v52 = vcombine.high %v481_v49, %v485_v50 }
  0xe4   :  { %2423 = vmatprep.subr.bf16.mxu0 %v2527_v56  ;;  %v2543_v56 = vld [vmem:[#allocation8 + $0xf8] sm:$0xff]  }
  0xe5   :  { %1236 = vmatpush1.bf16.msra.mxu1 %v2187_v10  ;;  %v2207_v10 = vcombine.low %v441_v4, %v445_v5  ;;  %v2552_v4 = vld [vmem:[#allocation8 + $0x98] sm:$0xff]   ;;  %v2553_v5 = vld [vmem:[#allocation8 + $0xd0] sm:$0xff]  }
  0xe6   :  { %1237 = vmatprep.subr.bf16.mxu1 %v2180_v11  ;;  %v425_v11 = vld [vmem:[#allocation7 + $0x58] sm:$0xff] }
  0xe7   :  { %v2191_v18 = vcombine.low %v425_v11, %v429_v12 }
  0xe9   :  { %1238 = vmatpush1.bf16.msra.mxu1 %v2179_v14  ;;  %v2192_v14 = vcombine.high %v425_v11, %v429_v12 }
  0xea   :  { %1239 = vmatprep.subr.bf16.mxu1 %v2300_v15  ;;  %v417_v15 = vld [vmem:[#allocation7 + $0x18] sm:$0xff] }
  0xeb   :  { %v2183_v23 = vcombine.low %v417_v15, %v421_v16 }
  0xed   :  { %1240 = vmatpush2.bf16.msra.mxu1 %v2299_v19  ;;  %v2184_v19 = vcombine.high %v417_v15, %v421_v16 }
  0xee   :  { %1241 = vmatprep.subr.bf16.mxu1 %v2292_v20  ;;  %v537_v20 = vld [vmem:[#allocation7 + $0x3d8] sm:$0xff] }
  0xef   :  { %v2303_v27 = vcombine.low %v537_v20, %v541_v21 }
  0xf1   :  { %1242 = vmatpush2.bf16.msra.mxu1 %v2291_v24  ;;  %v2304_v24 = vcombine.high %v537_v20, %v541_v21  ;;  %v2528_v21 = vld [vmem:[#allocation8 + $0x138] sm:$0xff]  }
  0xf2   :  { %1243 = vmatprep.subr.bf16.mxu1 %v2284_v25  ;;  %v529_v25 = vld [vmem:[#allocation7 + $0x398] sm:$0xff] }
  0xf3   :  { %v2295_v31 = vcombine.low %v529_v25, %v533_v26 }
  0xf5   :  { %1244 = vmatpush2.bf16.msra.mxu1 %v2283_v28  ;;  %v2296_v28 = vcombine.high %v529_v25, %v533_v26  ;;  %v2529_v26 = vld [vmem:[#allocation8 + $0x170] sm:$0xff]  }
  0xf6   :  { %1245 = vmatprep.subr.bf16.mxu1 %v2276_v29  ;;  %v521_v29 = vld [vmem:[#allocation7 + $0x358] sm:$0xff] }
  0xf7   :  { %v2287_v35 = vcombine.low %v521_v29, %v525_v30 }
  0xf9   :  { %1246 = vmatpush2.bf16.msra.mxu1 %v2275_v32  ;;  %v2288_v32 = vcombine.high %v521_v29, %v525_v30  ;;  %v2530_v30 = vld [vmem:[#allocation8 + $0x130] sm:$0xff]  }
  0xfa   :  { %1247 = vmatprep.subr.bf16.mxu1 %v2268_v33  ;;  %v513_v33 = vld [vmem:[#allocation7 + $0x318] sm:$0xff] }
  0xfb   :  { %v2279_v39 = vcombine.low %v513_v33, %v517_v34 }
  0xfd   :  { %1248 = vmatpush2.bf16.msra.mxu1 %v2267_v36  ;;  %v2280_v36 = vcombine.high %v513_v33, %v517_v34 }
  0xfe   :  { %1249 = vmatprep.subr.bf16.mxu1 %v2260_v37  ;;  %v505_v37 = vld [vmem:[#allocation7 + $0x2d8] sm:$0xff] }
  0xff   :  { %v2271_v43 = vcombine.low %v505_v37, %v509_v38 }
 0x101   :  { %1250 = vmatpush2.bf16.msra.mxu1 %v2259_v40  ;;  %v2272_v40 = vcombine.high %v505_v37, %v509_v38  ;;  %v2534_v37 = vld [vmem:[#allocation8 + $0x120] sm:$0xff]   ;;  %v2535_v38 = vld [vmem:[#allocation8 + $0x158] sm:$0xff]  }
 0x102   :  { %1251 = vmatprep.subr.bf16.mxu1 %v2252_v41  ;;  %v497_v41 = vld [vmem:[#allocation7 + $0x298] sm:$0xff] }
 0x103   :  { %v2264_v44 = vcombine.high %v497_v41, %v501_v42 }
 0x105   :  { %1252 = vmatpush2.bf16.msra.mxu1 %v2251_v45  ;;  %v489_v45 = vld [vmem:[#allocation7 + $0x258] sm:$0xff] }
 0x106   :  { %1253 = vmatprep.subr.bf16.mxu1 %v2244_v47  ;;  %v2263_v47 = vcombine.low %v497_v41, %v501_v42  ;;  %v2256_v48 = vcombine.high %v489_v45, %v493_v46  ;;  %v2538_v41 = vld [vmem:[#allocation8 + $0x110] sm:$0xff]   ;;  %v2539_v42 = vld [vmem:[#allocation8 + $0x148] sm:$0xff]  }
 0x109   :  { %1254 = vmatpush2.bf16.msra.mxu1 %v2243_v51  ;;  %v2255_v51 = vcombine.low %v489_v45, %v493_v46  ;;  %v2541_v45 = vld [vmem:[#allocation8 + $0x140] sm:$0xff]  }
 0x10a   :  { %1305 = vmatprep.subr.bf16.mxu1 %v2240_v53  ;;  %v2542_v46 = vld [vmem:[#allocation8 + $0x100] sm:$0xff]  }
 0x10c   :  { %1256 = vmatmul.mubr.bf16.vlgmr.msra.gmra.mxu1 %v2799_v17 }
 0x10d   :  { %1306 = vmatpush1.bf16.msra.mxu1 %v2239_v57  ;;  %1337 = vmatprep.mubr.bf16.mxu1 %v2796_v22  ;;  %v2200_v22 = vcombine.high %v433_v8, %v437_v9  ;;  %v2557_v8 = vld [vmem:[#allocation8 + $0xc0] sm:$0xff]  }
 0x10e   :  { %1307 = vmatprep.subr.bf16.mxu1 %v2232_v58  ;;  %v2544_v58 = vld [vmem:[#allocation8 + $0xb8] sm:$0xff]   ;;  %v2558_v9 = vld [vmem:[#allocation8 + $0x80] sm:$0xff]  }
 0x111   :  { %1308 = vmatpush1.bf16.msra.mxu1 %v2231_v61  ;;  %v2546_v61 = vld [vmem:[#allocation8 + $0xb0] sm:$0xff]  }
 0x112   :  { %1309 = vmatprep.subr.bf16.mxu1 %v2224_v62  ;;  %v2547_v62 = vld [vmem:[#allocation8 + $0xe8] sm:$0xff]  }
 0x115   :  { %1310 = vmatpush1.bf16.msra.mxu1 %v2223_v2  ;;  %v2550_v2 = vld [vmem:[#allocation8 + $0xa0] sm:$0xff]  }
 0x116   :  { %1311 = vmatprep.subr.bf16.mxu1 %v2216_v3  ;;  %v2551_v3 = vld [vmem:[#allocation8 + $0xd8] sm:$0xff]  }
 0x119   :  { %1312 = vmatpush1.bf16.msra.mxu1 %v2215_v6  ;;  %v2554_v6 = vld [vmem:[#allocation8 + $0x90] sm:$0xff]  }
 0x11a   :  { %1313 = vmatprep.subr.bf16.mxu1 %v2208_v7  ;;  %v2556_v7 = vld [vmem:[#allocation8 + $0x88] sm:$0xff]  }
 0x11d   :  { %1314 = vmatpush1.bf16.msra.mxu1 %v2207_v10  ;;  %v2559_v10 = vld [vmem:[#allocation8 + $0x1f8] sm:$0xff]  }
 0x11e   :  { %1315 = vmatprep.subr.bf16.mxu1 %v2200_v22 }
 0x121   :  { %1316 = vmatpush1.bf16.msra.mxu1 %v2199_v13 }
 0x122   :  { %1317 = vmatprep.subr.bf16.mxu1 %v2192_v14 }
 0x125   :  { %1318 = vmatpush1.bf16.msra.mxu1 %v2191_v18 }
 0x126   :  { %1319 = vmatprep.subr.bf16.mxu1 %v2184_v19 }
 0x129   :  { %1320 = vmatpush1.bf16.msra.mxu1 %v2183_v23 }
 0x12a   :  { %1321 = vmatprep.subr.bf16.mxu1 %v2304_v24 }
 0x12d   :  { %1322 = vmatpush2.bf16.msra.mxu1 %v2303_v27 }
 0x12e   :  { %1323 = vmatprep.subr.bf16.mxu1 %v2296_v28 }
 0x131   :  { %1324 = vmatpush2.bf16.msra.mxu1 %v2295_v31  ;;  %v2531_v31 = vld [vmem:[#allocation8 + $0x168] sm:$0xff]  }
 0x132   :  { %1325 = vmatprep.subr.bf16.mxu1 %v2288_v32 }
 0x135   :  { %1326 = vmatpush2.bf16.msra.mxu1 %v2287_v35  ;;  %v2532_v35 = vld [vmem:[#allocation8 + $0x128] sm:$0xff]  }
 0x136   :  { %1327 = vmatprep.subr.bf16.mxu1 %v2280_v36  ;;  %v2533_v36 = vld [vmem:[#allocation8 + $0x160] sm:$0xff]  }
 0x139   :  { %1328 = vmatpush2.bf16.msra.mxu1 %v2279_v39  ;;  %v2536_v39 = vld [vmem:[#allocation8 + $0x118] sm:$0xff]  }
 0x13a   :  { %1329 = vmatprep.subr.bf16.mxu1 %v2272_v40  ;;  %v2537_v40 = vld [vmem:[#allocation8 + $0x150] sm:$0xff]  }
 0x13d   :  { %1330 = vmatpush2.bf16.msra.mxu1 %v2271_v43  ;;  %v2540_v43 = vld [vmem:[#allocation8 + $0x108] sm:$0xff]  }
 0x13e   :  { %1331 = vmatprep.subr.bf16.mxu1 %v2264_v44 }
 0x141   :  { %1332 = vmatpush2.bf16.msra.mxu1 %v2263_v47 }
 0x142   :  { %1333 = vmatprep.subr.bf16.mxu1 %v2256_v48 }
 0x144   :  { %v1216_v53 = vpop.f32.mrf.mxu0 }
 0x145   :  { %1334 = vmatpush2.bf16.msra.mxu1 %v2255_v51 }
 0x146   :  { %1335 = vmatprep.subr.bf16.mxu1 %v2248_v52  ;;  %v1218_v55 = vpop.f32.mrf.mxu0 }
 0x148   :  { %v1220_v57 = vpop.f32.mrf.mxu0 }
 0x149   :  { %1336 = vmatpush2.bf16.msra.mxu1 %v2247_v54 }
 0x14a   :  { %v1221_v59 = vpop.f32.mrf.mxu0  ;;  %2401 = vmatprep.subr.bf16.mxu1 %v2543_v56 }
 0x14c   :  { %1338 = vmatmul.mubr.bf16.vlgmr.msra.gmra.mxu1 %v2799_v17  ;;  %v2555_v17 = vld [vmem:[#allocation8 + $0xc8] sm:$0xff]  }
 0x14d   :  { %2402 = vmatpush3.bf16.msra.mxu1 %v2544_v58 }
 0x14e   :  { %2403 = vmatprep.subr.bf16.mxu1 %v2545_v60  ;;  %v2560_v60 = vld [vmem:[#allocation8 + $0x1b8] sm:$0xff]  }
 0x151   :  { %2404 = vmatpush3.bf16.msra.mxu1 %v2546_v61 }
 0x152   :  { %2405 = vmatprep.subr.bf16.mxu1 %v2547_v62  ;;  %v2561_v62 = vld [vmem:[#allocation8 + $0x1f0] sm:$0xff]  }
 0x155   :  { %2406 = vmatpush3.bf16.msra.mxu1 %v2548_v63  ;;  %v2562_v63 = vld [vmem:[#allocation8 + $0x1b0] sm:$0xff]  }
 0x156   :  { %2407 = vmatprep.subr.bf16.mxu1 %v2549_v0  ;;  %v2563_v0 = vld [vmem:[#allocation8 + $0x1e8] sm:$0xff]  }
 0x159   :  { %2408 = vmatpush3.bf16.msra.mxu1 %v2550_v2  ;;  %v2564_v2 = vld [vmem:[#allocation8 + $0x1a8] sm:$0xff]  }
 0x15a   :  { %2409 = vmatprep.subr.bf16.mxu1 %v2551_v3  ;;  %v2565_v3 = vld [vmem:[#allocation8 + $0x1e0] sm:$0xff]  }
 0x15d   :  { %2410 = vmatpush3.bf16.msra.mxu1 %v2552_v4  ;;  %v2566_v4 = vld [vmem:[#allocation8 + $0x1a0] sm:$0xff]  }
 0x15e   :  { %2411 = vmatprep.subr.bf16.mxu1 %v2553_v5  ;;  %v2567_v5 = vld [vmem:[#allocation8 + $0x1d8] sm:$0xff]  }
 0x161   :  { %2412 = vmatpush3.bf16.msra.mxu1 %v2554_v6  ;;  %v2568_v6 = vld [vmem:[#allocation8 + $0x198] sm:$0xff]  }
 0x162   :  { %2413 = vmatprep.subr.bf16.mxu1 %v2555_v17  ;;  %v2569_v17 = vld [vmem:[#allocation8 + $0x1d0] sm:$0xff]  }
 0x165   :  { %2414 = vmatpush3.bf16.msra.mxu1 %v2556_v7  ;;  %v2570_v7 = vld [vmem:[#allocation8 + $0x190] sm:$0xff]  }
 0x166   :  { %2415 = vmatprep.subr.bf16.mxu1 %v2557_v8  ;;  %v2571_v8 = vld [vmem:[#allocation8 + $0x1c8] sm:$0xff]  }
 0x169   :  { %2416 = vmatpush3.bf16.msra.mxu1 %v2558_v9  ;;  %v2572_v9 = vld [vmem:[#allocation8 + $0x188] sm:$0xff]  }
 0x16a   :  { %2445 = vmatprep.subr.bf16.mxu1 %v2559_v10  ;;  %v2573_v10 = vld [vmem:[#allocation8 + $0x1c0] sm:$0xff]  }
 0x180   :  { %v192_v22 = vpop.f32.mrf.mxu1 }
 0x181   :  { %v1217_v11 = vadd.f32 %v1216_v53, %v192_v22  ;;  %v2574_v22 = vld [vmem:[#allocation8 + $0x180] sm:$0xff]  }
 0x182   :  { %v194_v12 = vpop.f32.mrf.mxu1 }
 0x183   :  { %v1219_v13 = vadd.f32 %v1218_v55, %v194_v12  ;;  %v1346_v14 = vmax.f32 %v1217_v11, 0.0 }
 0x184   :  { %v263_v15 = vpop.f32.mrf.mxu1 }
 0x185   :  { %v1347_v16 = vmax.f32 %v1219_v13, 0.0  ;;  %v1354_v23 = vpack.c.bf16 %v1346_v14, %v1346_v14 }
 0x186   :  { %v265_v18 = vpop.f32.mrf.mxu1  ;;  %v1298_v19 = vpop.f32.mrf.mxu0 }
 0x187   :  { %v1355_v20 = vpack.c.bf16 %v1347_v16, %v1347_v16 }
 0x188   :  { %v334_v24 = vpop.f32.mrf.mxu1  ;;  %v1300_v25 = vpop.f32.mrf.mxu0 }
 0x189   :  { %1913 = vmatprep.mubr.bf16.mxu0 %v1355_v20  ;;  %v1299_v44 = vadd.f32 %v1298_v19, %v334_v24  ;;  %v2576_v24 = vld [vmem:[#allocation10 + $0x30] sm:$0xff]  }
 0x18a   :  { %v336_v27 = vpop.f32.mrf.mxu1  ;;  %1914 = vmatmul.mubr.bf16.vlgmr.msra.gmra.mxu0 %v1354_v23  ;;  %v1302_v28 = vpop.f32.mrf.mxu0  ;;  %v2575_v23 = vld [vmem:[#allocation10 + $0x38] sm:$0xff]  }
 0x18b   :  { %v1301_v29 = vadd.f32 %v1300_v25, %v336_v27  ;;  %2424 = vmatpush3.bf16.msra.mxu0 %v2528_v21  ;;  %v1350_v47 = vmax.f32 %v1299_v44, 0.0  ;;  %v2577_v25 = vld [vmem:[#allocation10 + $0x28] sm:$0xff]   ;;  %v2579_v27 = vld [vmem:[#allocation10 + $0x18] sm:$0xff]  }
 0x18c   :  { %2425 = vmatprep.subr.bf16.mxu0 %v2529_v26  ;;  %v1303_v32 = vpop.f32.mrf.mxu0  ;;  %v405_v49 = vpop.f32.mrf.mxu1  ;;  %v2578_v26 = vld [vmem:[#allocation10 + $0x20] sm:$0xff]  }
 0x18d   :  { %v1351_v33 = vmax.f32 %v1301_v29, 0.0  ;;  %v1358_v48 = vpack.c.bf16 %v1350_v47, %v1350_v47 }
 0x18e   :  { %v407_v50 = vpop.f32.mrf.mxu1 }
 0x18f   :  { %v1359_v34 = vpack.c.bf16 %v1351_v33, %v1351_v33  ;;  %2426 = vmatpush3.bf16.msra.mxu0 %v2530_v30  ;;  %v2580_v33 = vld [vmem:[#allocation10 + $0x10] sm:$0xff]  }
 0x190   :  { %2427 = vmatprep.subr.bf16.mxu0 %v2531_v31 }
 0x191   :  { %1993 = vmatprep.mubr.bf16.mxu0 %v1359_v34  ;;  %v2581_v34 = vld [vmem:[#allocation10 + $0x8] sm:$0xff]  }
 0x193   :  { %2428 = vmatpush3.bf16.msra.mxu0 %v2532_v35  ;;  %v2582_v35 = vld [vmem:[#allocation10] sm:$0xff]  }
 0x194   :  { %2429 = vmatprep.subr.bf16.mxu0 %v2533_v36 }
 0x197   :  { %2430 = vmatpush3.bf16.msra.mxu0 %v2534_v37 }
 0x198   :  { %2431 = vmatprep.subr.bf16.mxu0 %v2535_v38 }
 0x19b   :  { %2432 = vmatpush3.bf16.msra.mxu0 %v2536_v39 }
 0x19c   :  { %2433 = vmatprep.subr.bf16.mxu0 %v2537_v40 }
 0x19f   :  { %2434 = vmatpush3.bf16.msra.mxu0 %v2538_v41  ;;  %v2305_v41 = vld [vmem:[%s2839_s5] ss:$0 sm:$0xff]  ;;  %s2724_s5 = smov [#allocation11]  }
 0x1a0   :  { %2435 = vmatprep.subr.bf16.mxu0 %v2539_v42  ;;  %s2161_s13 = sshll.u32 %s2724_s5, 4  ;;  %s2162_s13 = int_to_ptr.vmem [resolvable:$true] %s2161_s13 }
 0x1a1   :  { %s2683_s14 = scalar_lea.vmem %s2162_s13, 128  ;;  %p2688_p12 = scmp.lt.s32.totalorder %s2162_s13, %s2162_s13 }
 0x1a2   :  { %p2684_p11 = scmp.ne.s32.totalorder %s2162_s13, %s2683_s14  ;;  %p2689_p13 = scmp.lt.s32.totalorder %s2683_s14, %s2683_s14 }
 0x1a3   :  { %2436 = vmatpush3.bf16.msra.mxu0 %v2540_v43 }
 0x1a4   :  { %2437 = vmatprep.subr.bf16.mxu0 %v2541_v45  ;;  %p2690_p0 = por %p2689_p13, %p2688_p12 }
 0x1a6   :  { %p2691_p1 = pnand %p2690_p0, %p2684_p11 }
 0x1a7   :  { %2438 = vmatpush3.bf16.msra.mxu0 %v2542_v46 }
 0x1a8   :  { %2476 = vmatprep.subr.bf16.mxu0 %v2722_v1 }
 0x1aa   :  { %1994 = vmatmul.mubr.bf16.vlgmr.msra.gmra.mxu0 %v1358_v48 }
 0x1ab   :  { %2477 = vmatpush3.bf16.msra.mxu0 %v2575_v23  ;;  %2492 = vmatprep.mubr.msk.bf16.mxu0 %vm2723_vm2, %v2722_v1 }
 0x1ac   :  { %2478 = vmatprep.subr.bf16.mxu0 %v2722_v1 }
 0x1af   :  { %2479 = vmatpush3.bf16.msra.mxu0 %v2576_v24 }
 0x1b0   :  { %2480 = vmatprep.subr.bf16.mxu0 %v2722_v1 }
 0x1b3   :  { %2481 = vmatpush3.bf16.msra.mxu0 %v2577_v25 }
 0x1b4   :  { %2482 = vmatprep.subr.bf16.mxu0 %v2722_v1 }
 0x1b7   :  { %2483 = vmatpush3.bf16.msra.mxu0 %v2578_v26 }
 0x1b8   :  { %2484 = vmatprep.subr.bf16.mxu0 %v2722_v1 }
 0x1bb   :  { %2485 = vmatpush3.bf16.msra.mxu0 %v2579_v27 }
 0x1bc   :  { %2486 = vmatprep.subr.bf16.mxu0 %v2722_v1 }
 0x1bf   :  { %2487 = vmatpush3.bf16.msra.mxu0 %v2580_v33 }
 0x1c0   :  { %2488 = vmatprep.subr.bf16.mxu0 %v2722_v1 }
 0x1c3   :  { %2489 = vmatpush3.bf16.msra.mxu0 %v2581_v34 }
 0x1c4   :  { %2490 = vmatprep.subr.bf16.mxu0 %v2722_v1 }
 0x1c7   :  { %2491 = vmatpush3.bf16.msra.mxu0 %v2582_v35 }
 0x1cc   :  { %v1257_v51 = vpop.f32.mrf.mxu1 }
 0x1cd   :  { %v1258_v52 = vadd.f32 %v1257_v51, %v263_v15 }
 0x1ce   :  { %v1259_v53 = vpop.f32.mrf.mxu1 }
 0x1cf   :  { %v1260_v54 = vadd.f32 %v1259_v53, %v265_v18  ;;  %v1348_v55 = vmax.f32 %v1258_v52, 0.0 }
 0x1d0   :  { %v1261_v56 = vpop.f32.mrf.mxu1 }
 0x1d1   :  { %v1349_v57 = vmax.f32 %v1260_v54, 0.0  ;;  %v1356_v61 = vpack.c.bf16 %v1348_v55, %v1348_v55 }
 0x1d2   :  { %v1262_v58 = vpop.f32.mrf.mxu1 }
 0x1d3   :  { %v1357_v59 = vpack.c.bf16 %v1349_v57, %v1349_v57  ;;  %v2370_v57 = vld [vmem:[%s2841_s7] ss:$0 sm:$0xff] }
 0x1d5   :  { %1953 = vmatprep.mubr.bf16.mxu1 %v1357_v59 }
 0x1d6   :  { %1954 = vmatmul.mubr.bf16.vlgmr.msra.gmra.mxu1 %v1356_v61 }
 0x1d7   :  { %2446 = vmatpush3.bf16.msra.mxu1 %v2560_v60 }
 0x1d8   :  { %2447 = vmatprep.subr.bf16.mxu1 %v2561_v62 }
 0x1db   :  { %2448 = vmatpush3.bf16.msra.mxu1 %v2562_v63 }
 0x1dc   :  { %2449 = vmatprep.subr.bf16.mxu1 %v2563_v0 }
 0x1df   :  { %2450 = vmatpush3.bf16.msra.mxu1 %v2564_v2 }
 0x1e0   :  { %2451 = vmatprep.subr.bf16.mxu1 %v2565_v3 }
 0x1e3   :  { %2452 = vmatpush3.bf16.msra.mxu1 %v2566_v4 }
 0x1e4   :  { %2453 = vmatprep.subr.bf16.mxu1 %v2567_v5 }
 0x1e7   :  { %2454 = vmatpush3.bf16.msra.mxu1 %v2568_v6 }
 0x1e8   :  { %2455 = vmatprep.subr.bf16.mxu1 %v2569_v17 }
 0x1eb   :  { %2456 = vmatpush3.bf16.msra.mxu1 %v2570_v7 }
 0x1ec   :  { %2457 = vmatprep.subr.bf16.mxu1 %v2571_v8 }
 0x1ef   :  { %2458 = vmatpush3.bf16.msra.mxu1 %v2572_v9 }
 0x1f0   :  { %2459 = vmatprep.subr.bf16.mxu1 %v2573_v10 }
 0x1f3   :  { %2460 = vmatpush3.bf16.msra.mxu1 %v2574_v22 }
 0x20c   :  { %v1339_v11 = vpop.f32.mrf.mxu1 }
 0x20d   :  { %v1340_v12 = vadd.f32 %v1339_v11, %v405_v49 }
 0x20e   :  { %v1341_v13 = vpop.f32.mrf.mxu1 }
 0x20f   :  { %v1342_v14 = vadd.f32 %v1341_v13, %v407_v50  ;;  %v1352_v15 = vmax.f32 %v1340_v12, 0.0 }
 0x210   :  { %v1343_v16 = vpop.f32.mrf.mxu1 }
 0x211   :  { %v1353_v18 = vmax.f32 %v1342_v14, 0.0  ;;  %v1360_v21 = vpack.c.bf16 %v1352_v15, %v1352_v15 }
 0x212   :  { %v1344_v19 = vpop.f32.mrf.mxu1 }
 0x213   :  { %v1361_v20 = vpack.c.bf16 %v1353_v18, %v1353_v18 }
 0x215   :  { %2033 = vmatprep.mubr.bf16.mxu1 %v1361_v20 }
 0x216   :  { %2034 = vmatmul.mubr.bf16.vlgmr.msra.gmra.mxu1 %v1360_v21 }
 0x24a   :  { %v2395_v28 = vpop.f32.mrf.mxu0 }
 0x24c   :  { %v2396_v29 = vpop.f32.mrf.mxu0 }
 0x24d   :  { %v2397_v30 = vadd.f32 %v2396_v29, %v2395_v28 }
 0x24e   :  { %v2398_v31 = vpop.f32.mrf.mxu0 }
 0x24f   :  { %v1916_v44 = vadd.f32 %v2397_v30, %v2305_v41 }
 0x250   :  { %v2399_v32 = vpop.f32.mrf.mxu0 }
 0x26a   :  { %v2439_v36 = vpop.f32.mrf.mxu0 }
 0x26c   :  { %v2440_v37 = vpop.f32.mrf.mxu0 }
 0x26d   :  { %v2441_v38 = vadd.f32 %v2440_v37, %v2439_v36 }
 0x26e   :  { %v2442_v39 = vpop.f32.mrf.mxu0 }
 0x270   :  { %v2443_v40 = vpop.f32.mrf.mxu0 }
 0x296   :  { %v2417_v42 = vpop.f32.mrf.mxu1 }
 0x298   :  { %v2418_v43 = vpop.f32.mrf.mxu1 }
 0x299   :  { %v2419_v45 = vadd.f32 %v2418_v43, %v2417_v42 }
 0x29a   :  { %v2420_v46 = vpop.f32.mrf.mxu1 }
 0x29b   :  { %v1956_v47 = vadd.f32 %v2419_v45, %v1916_v44 }
 0x29c   :  { %v2421_v48 = vpop.f32.mrf.mxu1 }
 0x29d   :  { %v1996_v49 = vadd.f32 %v2441_v38, %v1956_v47 }
 0x2d6   :  { %v2461_v50 = vpop.f32.mrf.mxu1 }
 0x2d8   :  { %v2462_v51 = vpop.f32.mrf.mxu1 }
 0x2d9   :  { %v2463_v1 = vadd.f32 %v2462_v51, %v2461_v50 }
 0x2da   :  { %v2464_v52 = vpop.f32.mrf.mxu1 }
 0x2db   :  { %v2036_v53 = vadd.f32 %v2463_v1, %v1996_v49 }
 0x2dc   :  { %v2465_v54 = vpop.f32.mrf.mxu1 }
 0x2dd   :  { %v2041_v55 = vmax.f32 %v2036_v53, 0.0 }
 0x2df   :  { %v2042_v56 = vpack.c.bf16 %v2041_v55, %v2041_v55 }
 0x2e1   :  { %2493 = vmatmul.mubr.bf16.vlgmr.msra.gmra.mxu0 %v2042_v56 }
 0x3a1   :  { %v2148_v58 = vpop.f32.mrf.mxu0 }
 0x3a2   :  { %v2149_v59 = vadd.f32 %v2370_v57, %v2148_v58 }
 0x3a3   :  { %v2494_v60 = vpop.f32.mrf.mxu0 }
 0x3a4   :  { %2154 = vst [vmem:[#allocation11] sm:$0xff] %v2149_v59 }
 0x3a5   :  { %v2151_v61 = vpop.f32.mrf.mxu0 }
 0x3a6   :  { %2694 = shalt.err (!%p2691_p1)
}
 0x3a7   :  { %2164 = dma.vmem_to_hbm [thread:$0]  %s2162_s13, 128, %s2842_s8, [#allocation4]   ;;  %v2495_v62 = vpop.f32.mrf.mxu0 }
 0x3a8   :  { %2709 = dma.done.wait [#allocation4], 128  }
 0x3a9   :  { %2710 = vsyncadd [#allocation4], 4294967168 }
 0x3aa   :  { %2168 = vsyncpa [#allocation3], 1 }
 0x3ab   :  { %2169 = vsyncpa [#allocation6], 1 }
 0x3ac   :  { %2170 = vsyncpa [#allocation9], 1 }
 0x3ad   :  { %2171 = vsyncpa [#allocation4], 1 }

</bundles_post_ra>
